<compile_context>
chip_gen: v6e
topology: v6e:2x2x1
jax: 0.10.0
libtpu: 0.0.40
codegen_flags: <defaults>
</compile_context>

<pallas_src>
import functools
import math

import jax
import jax.numpy as jnp
from jax.experimental import pallas as pl
from jax.experimental.pallas import tpu as pltpu  # noqa: F401  (TPU backend)


def unit_brdc_kernel(x_ref, scale_ref, shift_ref, w_ref, b_ref, o_ref,
                     *, K, pad, stride, T_out):
    N, C_in, T = x_ref.shape
    C_out = w_ref.shape[0]

    x = x_ref[...]                                           # (N, C_in, T)

    # Folded BatchNorm1d (inference stats) + ReLU; Dropout is identity in eval.
    h = jnp.maximum(x * scale_ref[...] + shift_ref[...], 0.0)  # (N, C_in, T)

    # Build im2col matrix in registers (no VMEM scratch round trip).
    # Per batch: zero-pad time axis, stack K shifted taps along the row axis.
    cols = []
    for n in range(N):                                       # static unroll (N tiny)
        h_n = h[n]                                           # (C_in, T)
        if pad > 0:
            zpad = jnp.zeros((C_in, pad), jnp.float32)
            hp = jnp.concatenate([zpad, h_n, zpad], axis=1)  # (C_in, T + 2*pad)
        else:
            hp = h_n
        if stride == 1:
            taps = [hp[:, k:k + T_out] for k in range(K)]    # K x (C_in, T_out)
        else:
            taps = [jax.lax.slice(hp, (0, k),
                                  (C_in, k + stride * (T_out - 1) + 1),
                                  (1, stride))
                    for k in range(K)]
        cols.append(jnp.concatenate(taps, axis=0))           # (K*C_in, T_out)
    im2col = jnp.concatenate(cols, axis=1)                   # (K*C_in, N*T_out)

    # One MXU matmul for the whole batch + all taps, f32 accumulate.
    out_all = jnp.dot(w_ref[...], im2col,
                      preferred_element_type=jnp.float32) + b_ref[...]
    # out_all: (C_out, N*T_out)

    for n in range(N):                                       # static unroll
        o_ref[n] = out_all[:, n * T_out:(n + 1) * T_out].astype(o_ref.dtype)


def unit_brdc_pallas(x_ncl, gamma, beta, running_mean, running_var, w, b,
                     *, kernel_size, stride=1, eps=1e-5):
    N, C_in, T = x_ncl.shape
    C_out = w.shape[0]
    K = kernel_size
    pad = (K - 1) // 2                       # matches int((kernel_size-1)/2)
    T_out = (T + 2 * pad - K) // stride + 1

    # Fold BN (inference) into per-channel scale/shift (channels on sublanes).
    scale_vec = gamma * jax.lax.rsqrt(running_var + eps)
    shift_vec = beta - running_mean * scale_vec
    scale2 = scale_vec.reshape(C_in, 1).astype(jnp.float32)
    shift2 = shift_vec.reshape(C_in, 1).astype(jnp.float32)

    # Reorder conv weight (C_out, C_in, K) -> (C_out, K*C_in), tap-major /
    # channel-minor, to match the im2col row order.
    w2 = jnp.transpose(w, (0, 2, 1)).reshape(C_out, K * C_in).astype(jnp.float32)
    b2 = b.reshape(C_out, 1).astype(jnp.float32)

    kern = functools.partial(unit_brdc_kernel, K=K, pad=pad, stride=stride,
                             T_out=T_out)

    flops = 2 * N * T_out * C_out * K * C_in + 3 * N * C_in * T
    bytes_accessed = 4 * (N * C_in * T + 2 * C_in + C_out * (K * C_in + 1)
                          + N * C_out * T_out)

    # Single invocation: no grid, whole (tiny) arrays resident in VMEM.
    out = pl.pallas_call(
        kern,
        out_shape=jax.ShapeDtypeStruct((N, C_out, T_out), jnp.float32),
        cost_estimate=pl.CostEstimate(flops=flops, transcendentals=0,
                                      bytes_accessed=bytes_accessed),
    )(x_ncl.astype(jnp.float32), scale2, shift2, w2, b2)

    return out                                                # (N, C_out, T_out)


def unit_brdc_ref(x_ncl, gamma, beta, running_mean, running_var, w, b,
                  *, kernel_size, stride=1, eps=1e-5):
    # Pure-JAX reference for correctness checking (inference semantics).
    h = (x_ncl - running_mean[None, :, None]) * (
        gamma[None, :, None] * jax.lax.rsqrt(running_var + eps)[None, :, None]
    ) + beta[None, :, None]
    h = jnp.maximum(h, 0.0)
    pad = (kernel_size - 1) // 2
    out = jax.lax.conv_general_dilated(
        h, w, window_strides=(stride,), padding=[(pad, pad)],
        dimension_numbers=("NCH", "OIH", "NCH"))
    return out + b[None, :, None]


if __name__ == "__main__":
    # Module config: Unit_brdc(D_in=4, D_out=8, kernel_size=3, stride=1)
    N, D_in, D_out, T, K, stride = 2, 4, 8, 16, 3, 1

    key = jax.random.PRNGKey(0)
    kx, kw, kb, kg, kbe, km, kv = jax.random.split(key, 7)

    x = jax.random.normal(kx, (N, D_in, T), dtype=jnp.float32)

    # conv_init: weight ~ N(0, sqrt(2 / (D_out * K)))
    w = jax.random.normal(kw, (D_out, D_in, K), dtype=jnp.float32) * math.sqrt(
        2.0 / (D_out * K))
    # Conv1d default bias init: U(-1/sqrt(fan_in), 1/sqrt(fan_in))
    bound = 1.0 / math.sqrt(D_in * K)
    b = jax.random.uniform(kb, (D_out,), minval=-bound, maxval=bound,
                           dtype=jnp.float32)
    # BatchNorm1d params / running stats (deterministic, non-trivial)
    gamma = jax.random.uniform(kg, (D_in,), minval=0.5, maxval=1.5,
                               dtype=jnp.float32)
    beta = 0.1 * jax.random.normal(kbe, (D_in,), dtype=jnp.float32)
    running_mean = 0.1 * jax.random.normal(km, (D_in,), dtype=jnp.float32)
    running_var = jax.random.uniform(kv, (D_in,), minval=0.5, maxval=1.5,
                                     dtype=jnp.float32)

    out = unit_brdc_pallas(x, gamma, beta, running_mean, running_var, w, b,
                           kernel_size=K, stride=stride)
    out = jax.block_until_ready(out)

    ref = unit_brdc_ref(x, gamma, beta, running_mean, running_var, w, b,
                        kernel_size=K, stride=stride)
    assert out.shape == (N, D_out, T)
    assert jnp.allclose(out, ref, atol=1e-3, rtol=1e-3), "mismatch vs reference"

    print("KERNEL_OK")
</pallas_src>

<mosaic_0001>
module attributes {stable_mosaic.version = 11 : i64} {
  func.func @unit_brdc_kernel(%arg0: memref<2x4x16xf32, #tpu.memory_space<vmem>>, %arg1: memref<4x1xf32, #tpu.memory_space<vmem>>, %arg2: memref<4x1xf32, #tpu.memory_space<vmem>>, %arg3: memref<8x12xf32, #tpu.memory_space<vmem>>, %arg4: memref<8x1xf32, #tpu.memory_space<vmem>>, %arg5: memref<2x8x16xf32, #tpu.memory_space<vmem>>) attributes {dimension_semantics = [], scalar_prefetch = 0 : i64, scratch_operands = 0 : i64, tpu.core_type = #tpu.core_type<tc>} {
    %c0 = arith.constant 0 : index
    %c0_0 = arith.constant 0 : index
    %c0_1 = arith.constant 0 : index
    %0 = vector.load %arg0[%c0, %c0_0, %c0_1] : memref<2x4x16xf32, #tpu.memory_space<vmem>>, vector<2x4x16xf32>
    %c0_2 = arith.constant 0 : index
    %c0_3 = arith.constant 0 : index
    %1 = vector.load %arg1[%c0_2, %c0_3] : memref<4x1xf32, #tpu.memory_space<vmem>>, vector<4x1xf32>
    %2 = vector.shape_cast %1 : vector<4x1xf32> to vector<1x4x1xf32>
    %3 = vector.broadcast %2 : vector<1x4x1xf32> to vector<2x4x16xf32>
    %4 = arith.mulf %0, %3 : vector<2x4x16xf32>
    %c0_4 = arith.constant 0 : index
    %c0_5 = arith.constant 0 : index
    %5 = vector.load %arg2[%c0_4, %c0_5] : memref<4x1xf32, #tpu.memory_space<vmem>>, vector<4x1xf32>
    %6 = vector.shape_cast %5 : vector<4x1xf32> to vector<1x4x1xf32>
    %7 = vector.broadcast %6 : vector<1x4x1xf32> to vector<2x4x16xf32>
    %8 = arith.addf %4, %7 : vector<2x4x16xf32>
    %cst = arith.constant 0.000000e+00 : f32
    %9 = vector.broadcast %cst : f32 to vector<2x4x16xf32>
    %10 = arith.maximumf %8, %9 : vector<2x4x16xf32>
    %11 = vector.extract_strided_slice %10 {offsets = [0, 0, 0], sizes = [1, 4, 16], strides = [1, 1, 1]} : vector<2x4x16xf32> to vector<1x4x16xf32>
    %12 = vector.shape_cast %11 : vector<1x4x16xf32> to vector<4x16xf32>
    %cst_6 = arith.constant 0.000000e+00 : f32
    %13 = vector.broadcast %cst_6 : f32 to vector<4x1xf32>
    %14 = tpu.concatenate %13, %12, %13 in 1 : vector<4x1xf32>, vector<4x16xf32>, vector<4x1xf32> -> vector<4x18xf32>
    %15 = vector.extract_strided_slice %14 {offsets = [0, 0], sizes = [4, 16], strides = [1, 1]} : vector<4x18xf32> to vector<4x16xf32>
    %16 = vector.extract_strided_slice %14 {offsets = [0, 1], sizes = [4, 16], strides = [1, 1]} : vector<4x18xf32> to vector<4x16xf32>
    %17 = vector.extract_strided_slice %14 {offsets = [0, 2], sizes = [4, 16], strides = [1, 1]} : vector<4x18xf32> to vector<4x16xf32>
    %18 = tpu.concatenate %15, %16, %17 in 0 : vector<4x16xf32>, vector<4x16xf32>, vector<4x16xf32> -> vector<12x16xf32>
    %19 = vector.extract_strided_slice %10 {offsets = [1, 0, 0], sizes = [1, 4, 16], strides = [1, 1, 1]} : vector<2x4x16xf32> to vector<1x4x16xf32>
    %20 = vector.shape_cast %19 : vector<1x4x16xf32> to vector<4x16xf32>
    %cst_7 = arith.constant 0.000000e+00 : f32
    %21 = vector.broadcast %cst_7 : f32 to vector<4x1xf32>
    %22 = tpu.concatenate %21, %20, %21 in 1 : vector<4x1xf32>, vector<4x16xf32>, vector<4x1xf32> -> vector<4x18xf32>
    %23 = vector.extract_strided_slice %22 {offsets = [0, 0], sizes = [4, 16], strides = [1, 1]} : vector<4x18xf32> to vector<4x16xf32>
    %24 = vector.extract_strided_slice %22 {offsets = [0, 1], sizes = [4, 16], strides = [1, 1]} : vector<4x18xf32> to vector<4x16xf32>
    %25 = vector.extract_strided_slice %22 {offsets = [0, 2], sizes = [4, 16], strides = [1, 1]} : vector<4x18xf32> to vector<4x16xf32>
    %26 = tpu.concatenate %23, %24, %25 in 0 : vector<4x16xf32>, vector<4x16xf32>, vector<4x16xf32> -> vector<12x16xf32>
    %27 = tpu.concatenate %18, %26 in 1 : vector<12x16xf32>, vector<12x16xf32> -> vector<12x32xf32>
    %c0_8 = arith.constant 0 : index
    %c0_9 = arith.constant 0 : index
    %28 = vector.load %arg3[%c0_8, %c0_9] : memref<8x12xf32, #tpu.memory_space<vmem>>, vector<8x12xf32>
    %cst_10 = arith.constant dense<0.000000e+00> : vector<8x32xf32>
    %29 = tpu.matmul %28, %27, %cst_10 {dimension_numbers = #tpu.dot_dimension_numbers<[1], [0], [0], [1], [0, 0, 1, 1], [], []>} : vector<8x12xf32>, vector<12x32xf32>, vector<8x32xf32> -> vector<8x32xf32>
    %c0_11 = arith.constant 0 : index
    %c0_12 = arith.constant 0 : index
    %30 = vector.load %arg4[%c0_11, %c0_12] : memref<8x1xf32, #tpu.memory_space<vmem>>, vector<8x1xf32>
    %31 = vector.broadcast %30 : vector<8x1xf32> to vector<8x32xf32>
    %32 = arith.addf %29, %31 : vector<8x32xf32>
    %33 = vector.extract_strided_slice %32 {offsets = [0, 0], sizes = [8, 16], strides = [1, 1]} : vector<8x32xf32> to vector<8x16xf32>
    %c0_13 = arith.constant 0 : index
    %c0_14 = arith.constant 0 : index
    %c0_15 = arith.constant 0 : index
    %34 = vector.load %arg5[%c0_13, %c0_14, %c0_15] : memref<2x8x16xf32, #tpu.memory_space<vmem>>, vector<1x8x16xf32>
    %35 = vector.shape_cast %34 : vector<1x8x16xf32> to vector<8x16xf32>
    %36 = vector.shape_cast %33 : vector<8x16xf32> to vector<1x8x16xf32>
    tpu.vector_store %arg5[%c0_13, %c0_14, %c0_15], %36 {strides = array<i32>} : memref<2x8x16xf32, #tpu.memory_space<vmem>>, vector<1x8x16xf32>,
    %37 = vector.extract_strided_slice %32 {offsets = [0, 16], sizes = [8, 16], strides = [1, 1]} : vector<8x32xf32> to vector<8x16xf32>
    %c1 = arith.constant 1 : index
    %c0_16 = arith.constant 0 : index
    %c0_17 = arith.constant 0 : index
    %38 = vector.load %arg5[%c1, %c0_16, %c0_17] : memref<2x8x16xf32, #tpu.memory_space<vmem>>, vector<1x8x16xf32>
    %39 = vector.shape_cast %38 : vector<1x8x16xf32> to vector<8x16xf32>
    %40 = vector.shape_cast %37 : vector<8x16xf32> to vector<1x8x16xf32>
    tpu.vector_store %arg5[%c1, %c0_16, %c0_17], %40 {strides = array<i32>} : memref<2x8x16xf32, #tpu.memory_space<vmem>>, vector<1x8x16xf32>,
    return
  }
}

</mosaic_0001>

<bundles_post_ra>
// kernel: tpu_custom_call.1
= control target key start
LH: loop header
LB: loop body
LE: loop exit
PB: predicated region body
PF: predicated region fallthrough
CT: control target
= control target key end

     0   :  { %v236_v1 = vmov 0   ;;  %s302_s0 = inlined_call_operand.vmem [shape: f32[2,4,16], index: 0, kind: input, shape index: {}]   ;;  %s303_s1 = inlined_call_operand.vmem [shape: f32[4,1], index: 1, kind: input, shape index: {}]   ;;  %s304_s2 = inlined_call_operand.vmem [shape: f32[4,1], index: 2, kind: input, shape index: {}]   ;;  %s305_s3 = inlined_call_operand.vmem [shape: f32[8,12], index: 3, kind: input, shape index: {}]   ;;  %s306_s4 = inlined_call_operand.vmem [shape: f32[8,1], index: 4, kind: input, shape index: {}]   ;;  %s307_s5 = inlined_call_operand.hbm [shape: f32[2,8,16], index: 5, kind: output, shape index: {}]  }
   0x1   :  { %v23_v0 = vld [vmem:[%s303_s1] sm:$0xf]  ;;  %213 = vset.pattern.permute.xlu0 %v236_v1 }
   0x2   :  { %10 = vsyncpa [#allocation3], 0  ;;  %26 = vperm.xlu0 %213, %v23_v0   ;;  %v31_v2 = vld [vmem:[%s304_s2] sm:$0xf]  ;;  %v22_v4 = vld [vmem:[%s302_s0 + $0x4] sm:$0xf] }
   0x3   :  { %v21_v5 = vld [vmem:[%s302_s0] sm:$0xf]  ;;  %s237_s1 = smov 1   ;;  %vm45_vm0 = vcmask 7168   ;;  %vm47_vm1 = vcmask 138240   ;;  %s238_s2 = smov 126  }
   0x4   :  { %s239_s0 = smov 127   ;;  %v84_v21 = vld [vmem:[%s306_s4] sm:$0xff]  ;;  %v240_v22 = vmov 0.0   ;;  %vm241_vm2 = vmmov 0   ;;  %vm57_vm3 = vcmask 1043456   ;;  %s242_s28 = smov 16  }
   0x5   :  { %195 = vmatprep.subr.mxu0 %v240_v22  ;;  %199 = vmatprep.mubr.msk.f32.mxu0 %vm241_vm2, %v240_v22  ;;  %vm80_vm4 = vcmask 130048   ;;  %v83_v32 = vld [vmem:[%s305_s3] sm:$0xff]  ;;  %vm90_vm5 = vcmask 97280   ;;  %s243_s30 = smov 112   ;;  %s244_s6 = smov [#allocation2]  }
   0x6   :  { %34 = vperm.xlu0 %213, %v31_v2   ;;  %s179_s7 = sshll.u32 %s244_s6, 4  ;;  %s180_s7 = int_to_ptr.vmem [resolvable:$true] %s179_s7 }
   0x7   :  { %s214_s3 = scalar_lea.vmem %s180_s7, 256  ;;  %p219_p1 = scmp.lt.s32.totalorder %s180_s7, %s180_s7 }
   0x8   :  { %p215_p0 = scmp.ne.s32.totalorder %s180_s7, %s214_s3  ;;  %p220_p2 = scmp.lt.s32.totalorder %s214_s3, %s214_s3 }
   0xa   :  { %p221_p3 = por %p220_p2, %p219_p1 }
   0xc   :  { %p222_p4 = pnand %p221_p3, %p215_p0 }
  0x7d   :  { %v27_v3 = vpop.permute.xlu0 %26 }
  0x7e   :  { %v30_v6 = vmul.f32 %v27_v3, %v22_v4  ;;  %v29_v8 = vmul.f32 %v27_v3, %v21_v5 }
  0x81   :  { %v35_v7 = vpop.permute.xlu0 %34 }
  0x82   :  { %v38_v9 = vadd.f32 %v35_v7, %v30_v6  ;;  %v37_v10 = vadd.f32 %v35_v7, %v29_v8 }
  0x84   :  { %v40_v11 = vmax.f32 %v38_v9, 0.0  ;;  %v39_v12 = vmax.f32 %v37_v10, 0.0 }
  0x86   :  { %60 = vrot.lane.b32.xlu1 %v40_v11, %s237_s1 }
  0x8a   :  { %42 = vrot.lane.b32.xlu1 %v39_v12, %s237_s1 }
  0xf8   :  { %v61_v13 = vpop.permute.xlu1 %60 }
  0xf9   :  { %v63_v14 = vsel %vm45_vm0, 0.0, %v61_v13 }
  0xfa   :  { %v64_v15 = vsel %vm47_vm1, %v63_v14, 0.0 }
  0xfb   :  { %v66_v16 = vrot.slane %v64_v15, 4  ;;  %70 = vrot.lane.b32.xlu0 %v64_v15, %s238_s2 }
  0xfc   :  { %v43_v17 = vpop.permute.xlu1 %42 }
  0xfd   :  { %v46_v18 = vsel %vm45_vm0, 0.0, %v43_v17  ;;  %67 = vrot.lane.b32.xlu1 %v66_v16, %s239_s0 }
  0xfe   :  { %v48_v19 = vsel %vm47_vm1, %v46_v18, 0.0 }
  0xff   :  { %54 = vrot.lane.b32.xlu0 %v48_v19, %s238_s2  ;;  %v50_v20 = vrot.slane %v48_v19, 4 }
 0x103   :  { %51 = vrot.lane.b32.xlu0 %v50_v20, %s239_s0 }
 0x107   :  { %87 = vperm.xlu0 %213, %v84_v21  }
 0x16d   :  { %v71_v23 = vpop.permute.xlu0 %70 }
 0x16e   :  { %76 = vrot.lane.b32.xlu1 %v71_v23, %s242_s28 }
 0x16f   :  { %v68_v24 = vpop.permute.xlu1 %67 }
 0x170   :  { %v72_v25 = vsel %vm57_vm3, %v64_v15, %v68_v24 }
 0x171   :  { %v55_v26 = vpop.permute.xlu0 %54 }
 0x172   :  { %74 = vrot.lane.b32.xlu1 %v72_v25, %s242_s28 }
 0x175   :  { %v52_v28 = vpop.permute.xlu0 %51 }
 0x176   :  { %v58_v30 = vsel %vm57_vm3, %v48_v19, %v52_v28 }
 0x182   :  { %v88_v34 = vpop.permute.xlu0 %87 }
 0x1e0   :  { %v77_v27 = vpop.permute.xlu1 %76 }
 0x1e1   :  { %v82_v29 = vsel %vm80_vm4, %v55_v26, %v77_v27 }
 0x1e2   :  { %196 = vmatpush3.msk.msra.mxu0 %vm57_vm3, %v82_v29 }
 0x1e3   :  { %197 = vmatprep.subr.mxu0 %v240_v22 }
 0x1e4   :  { %v75_v31 = vpop.permute.xlu1 %74 }
 0x1e5   :  { %v81_v33 = vsel %vm80_vm4, %v58_v30, %v75_v31 }
 0x1e6   :  { %198 = vmatpush3.msra.mxu0 %v81_v33 }
 0x1e7   :  { %200 = vmatmul.mubr.msk.f32.vlgmr.msra.gmra.mxu0 %vm90_vm5, %v83_v32 }
 0x2a7   :  { %v163_v35 = vpop.f32.mrf.mxu0 }
 0x2a8   :  { %v164_v36 = vadd.f32 %v163_v35, %v88_v34 }
 0x2a9   :  { %v201_v37 = vpop.f32.mrf.mxu0 }
 0x2aa   :  { %167 = vst.msk [vmem:[#allocation2] sm:$0xff] %vm80_vm4, %v164_v36  ;;  %169 = vrot.lane.b32.xlu1 %v164_v36, %s243_s30 }
 0x31c   :  { %v170_v38 = vpop.permute.xlu1 %169 }
 0x31d   :  { %173 = vst.msk [vmem:[#allocation2 + $0x8] sm:$0xff] %vm80_vm4, %v170_v38 }
 0x31e   :  { %225 = shalt.err (!%p222_p4)
}
 0x31f   :  { %s245_s8 = smov 128   ;;  %s246_s9 = smov 8  }
 0x320   :  { %185 = dma.vmem_to_hbm [thread:$0]  %s180_s7, 256, %s307_s5, [#allocation3], %s245_s8, %s245_s8, %s246_s9  }
 0x321   :  { %234 = dma.done.wait [#allocation3], 256  }
 0x322   :  { %235 = vsyncadd [#allocation3], 4294967040 }
 0x323   :  { %189 = vsyncpa [#allocation3], 1 }

</bundles_post_ra>
